<compile_context>
chip_gen: v7x
topology: tpu7x:2x2x1
jax: 0.10.0
libtpu: 0.0.40
codegen_flags: <defaults>
</compile_context>

<pallas_src>
import functools
import math

import jax
import jax.numpy as jnp
import numpy as np
from jax.experimental import pallas as pl
from jax.experimental.pallas import tpu as pltpu


_LANES = 128
_VMEM_BUDGET_BYTES = 16 * 1024 * 1024   # per-step working-set target (2x headroom vs limit)
_VMEM_LIMIT_BYTES = 32 * 1024 * 1024    # explicit scoped-VMEM limit, safe on v5e/v6e/v7x


def _cdiv(a, b):
    return (a + b - 1) // b


def _round_up(x, m):
    return _cdiv(x, m) * m


def _conv1d_kernel(x_ref, lhalo_ref, rhalo_ref, w_ref, b_ref, o_ref, *,
                   K, pad_l, pad_r, P, TL, HALO, L):
    """One (batch, L-tile) grid step.

    x_ref:     (TL, H_in)      f32  rows [t*TL, (t+1)*TL) of x (tail rows may be OOB garbage)
    lhalo_ref: (HALO, H_in)    f32  rows [t*TL-HALO, t*TL)       (block index clamped at t==0)
    rhalo_ref: (HALO, H_in)    f32  rows [(t+1)*TL, (t+1)*TL+HALO) (clamped at the end)
    w_ref:     (P*K*H_in, N)   bf16 block-diagonal packed conv weight
    b_ref:     (1, N)          f32  packed bias
    o_ref:     (TL//P, N)      bf16 packed, lane-dense output tile
    """
    t = pl.program_id(1)
    TLP = TL // P

    # ---- padded window: rows x_pad[t*TL - pad_l + j], j in [0, TL + K - 1) ------------
    cur = x_ref[...]                                                    # (TL, H_in) f32
    row = jax.lax.broadcasted_iota(jnp.int32, (TL, 1), 0) + t * TL
    cur = jnp.where(row < L, cur, 0.0)              # zero ragged tail / OOB garbage rows

    pieces = []
    if pad_l > 0:
        left = lhalo_ref[...][HALO - pad_l:, :]                         # (pad_l, H_in)
        left = left * (t > 0).astype(left.dtype)    # left zero-pad on the first tile
        pieces.append(left)
    pieces.append(cur)
    if pad_r > 0:
        right = rhalo_ref[...][:pad_r, :]                               # (pad_r, H_in)
        rrow = jax.lax.broadcasted_iota(jnp.int32, (pad_r, 1), 0) + (t + 1) * TL
        right = jnp.where(rrow < L, right, 0.0)     # right zero-pad past the true length
        pieces.append(right)
    window = pieces[0] if len(pieces) == 1 else jnp.concatenate(pieces, axis=0)

    # ---- packed im2col: P output positions share one 128-lane output row --------------
    # out row r of this tile holds positions t*TL + p*TLP + r for p = 0..P-1, so column
    # block (p, k) of the lhs is the contiguous window slice starting at p*TLP + k.
    cols = []
    for p in range(P):
        for k in range(K):
            cols.append(window[p * TLP + k:p * TLP + k + TLP, :].astype(jnp.bfloat16))
    lhs = cols[0] if len(cols) == 1 else jnp.concatenate(cols, axis=-1)  # (TLP, P*K*H_in)

    acc = jnp.dot(lhs, w_ref[...], preferred_element_type=jnp.float32)   # (TLP, N) f32
    o_ref[...] = (acc + b_ref[...]).astype(o_ref.dtype)


def conv_forward(x, weight, bias, kernel_size, pad_type, *, tl_max=2048):
    """Forward of `Conv`: x [B, L, H_in] f32 -> [B, L, H_out].

    weight: [H_out, H_in, K] (PyTorch Conv1d layout).  bias: [H_out].
    """
    B, L, H_in = x.shape
    H_out = weight.shape[0]
    K = int(kernel_size)
    assert weight.shape == (H_out, H_in, K) and bias.shape == (H_out,)
    assert K >= 1 and L >= 1

    if pad_type == "left":
        pad_l, pad_r = K - 1, 0
    else:  # 'both'
        pad_l, pad_r = K // 2, (K - 1) // 2

    # ---- output packing: P positions per 128-lane row (no channel padding) ------------
    if H_out < _LANES and _LANES % H_out == 0 and _LANES // H_out <= 16:
        P, N = _LANES // H_out, _LANES
    else:
        P, N = 1, _round_up(H_out, _LANES)

    HALO = max(8, _round_up(max(K - 1, 1), 8))
    assert K - 1 <= HALO
    step = math.lcm(8 * P, HALO)        # TL must be a multiple of 8*P and of HALO

    # ---- VMEM-budget-aware L-tile, >=2 grid steps for v7x megacore --------------------
    def _vmem_bytes(tl):
        tlp = tl // P
        return (2 * tl * H_in * 4               # input tile (f32, double-buffered)
                + 4 * HALO * H_in * 4           # halo blocks
                + 2 * (P * K * H_in) * N * 2    # weight (bf16)
                + 2 * N * 4                     # bias
                + 2 * tlp * N * 2               # output tile (bf16, double-buffered)
                + (tl + 2 * HALO) * H_in * 4    # f32 window temporary
                + tl * K * H_in * (4 + 2)       # tap slices + packed bf16 im2col
                + tlp * N * 4)                  # f32 accumulator

    if L < step:
        TL = step                                # tiny input: one padded tile
    else:
        cap = min(max(step, (tl_max // step) * step), (L // step) * step)
        TL = step
        while TL + step <= cap and _vmem_bytes(TL + step) <= _VMEM_BUDGET_BYTES:
            TL += step
        if B * _cdiv(L, TL) < 2 and L // step >= 2:
            # v7x: make sure both TensorCores get at least one grid step.
            TL = min(TL, _round_up(_cdiv(L, 2), step))
    TLP = TL // P
    num_t = _cdiv(L, TL)
    hbpt = TL // HALO

    # Only tiny inputs (L < step) need a physical pad; otherwise x is read in place and
    # the ragged last tile is masked in-kernel.
    x_in = jnp.pad(x, ((0, 0), (0, TL - L), (0, 0))) if L < TL else x
    n_halo_blocks = _cdiv(x_in.shape[1], HALO)

    # ---- weight / bias packing ---------------------------------------------------------
    w_flat = jnp.transpose(weight, (2, 1, 0)).reshape(K * H_in, H_out)   # tap-major
    if P > 1:
        w_big = jnp.kron(jnp.eye(P, dtype=w_flat.dtype), w_flat)         # (P*K*H_in, 128)
        b_big = jnp.tile(bias, P)
    else:
        w_big = jnp.pad(w_flat, ((0, 0), (0, N - H_out)))
        b_big = jnp.pad(bias, (0, N - H_out))
    w_big = w_big.astype(jnp.bfloat16)
    b_big = b_big.reshape(1, N).astype(jnp.float32)

    w_spec_kwargs = {}
    if w_big.size * 2 > (4 << 20):
        # Large weights: keep a single resident VMEM copy (constant block index anyway);
        # saves VMEM that directly buys a bigger TL on v7x's 64 MiB.
        w_spec_kwargs["pipeline_mode"] = pl.Buffered(1)

    kernel = functools.partial(_conv1d_kernel, K=K, pad_l=pad_l, pad_r=pad_r,
                               P=P, TL=TL, HALO=HALO, L=L)

    out_k = pl.pallas_call(
        kernel,
        out_shape=jax.ShapeDtypeStruct((B, num_t * TLP, N), jnp.bfloat16),
        grid=(B, num_t),
        in_specs=[
            # current L-tile (batch dim squeezed out of the kernel ref)
            pl.BlockSpec((None, TL, H_in), lambda b, t: (b, t, 0)),
            # left halo: HALO rows immediately before the tile (clamped at t == 0)
            pl.BlockSpec((None, HALO, H_in),
                         lambda b, t: (b, jnp.maximum(t * hbpt - 1, 0), 0)),
            # right halo: HALO rows immediately after the tile (clamped at the end)
            pl.BlockSpec((None, HALO, H_in),
                         lambda b, t: (b, jnp.minimum((t + 1) * hbpt, n_halo_blocks - 1), 0)),
            # weight / bias: resident across the whole grid
            pl.BlockSpec((P * K * H_in, N), lambda b, t: (0, 0), **w_spec_kwargs),
            pl.BlockSpec((1, N), lambda b, t: (0, 0)),
        ],
        out_specs=pl.BlockSpec((None, TLP, N), lambda b, t: (b, t, 0)),
        compiler_params=pltpu.CompilerParams(
            dimension_semantics=("parallel", "parallel"),
            vmem_limit_bytes=_VMEM_LIMIT_BYTES),
    )(x_in, x_in, x_in, w_big, b_big)

    # ---- unpack (B, num_t*TLP, P*H_out) -> (B, L, H_out) -------------------------------
    if P > 1:
        o = out_k.reshape(B, num_t, TLP, P, H_out)
        o = jnp.transpose(o, (0, 1, 3, 2, 4)).reshape(B, num_t * TL, H_out)
    else:
        o = out_k[:, :, :H_out]
    return o[:, :L, :].astype(x.dtype)


def conv_reference(x, weight, bias, kernel_size, pad_type):
    """Pure-JAX f32 reference mirroring the PyTorch module."""
    K = kernel_size
    if pad_type == "left":
        pad_l, pad_r = K - 1, 0
    else:
        pad_l, pad_r = K // 2, (K - 1) // 2
    B, L, _ = x.shape
    x_pad = jnp.pad(x, ((0, 0), (pad_l, pad_r), (0, 0)))
    w_klc = jnp.transpose(weight, (2, 1, 0))                            # [K, H_in, H_out]
    out = jnp.zeros((B, L, weight.shape[0]), jnp.float32)
    for k in range(K):
        out = out + jnp.einsum("blc,co->blo", x_pad[:, k:k + L, :], w_klc[k])
    return out + bias[None, None, :]


def conv_reference_matched(x, weight, bias, kernel_size, pad_type):
    """Reference with the kernel's precision: bf16 inputs, f32 accum, bf16 output."""
    xq = x.astype(jnp.bfloat16).astype(jnp.float32)
    wq = weight.astype(jnp.bfloat16).astype(jnp.float32)
    out = conv_reference(xq, wq, bias, kernel_size, pad_type)
    return out.astype(jnp.bfloat16).astype(jnp.float32)


if __name__ == "__main__":
    key = jax.random.PRNGKey(0)

    configs = [
        # (B,  L, H_in, H_out, K, pad_type, tl_max)
        (2, 16, 32, 32, 3, "left", 2048),   # packed output (P=4), single tile
        (2, 16, 32, 32, 3, "both", 2048),   # 'both' padding
        (1, 80, 32, 32, 5, "both", 32),     # multi-tile: halos both sides + ragged tail
        (1, 64, 32, 32, 3, "left", 2048),   # B=1 auto-split into >=2 tiles (megacore)
        (2, 24, 32, 48, 3, "left", 2048),   # H_out not a divisor of 128 -> padded fallback
    ]

    ok = True
    for (B, L, H_in, H_out, K, pad_type, tl_max) in configs:
        kx, kw, kb, key = jax.random.split(key, 4)
        x = jax.random.normal(kx, (B, L, H_in), dtype=jnp.float32)
        bound = 1.0 / float(np.sqrt(H_in * K))
        weight = jax.random.uniform(kw, (H_out, H_in, K),
                                    minval=-bound, maxval=bound, dtype=jnp.float32)
        bias = jax.random.uniform(kb, (H_out,),
                                  minval=-bound, maxval=bound, dtype=jnp.float32)

        out = conv_forward(x, weight, bias, K, pad_type, tl_max=tl_max)
        out = jax.block_until_ready(out)
        assert out.shape == (B, L, H_out), (out.shape, (B, L, H_out))

        ref_m = conv_reference_matched(x, weight, bias, K, pad_type)
        ref_f = conv_reference(x, weight, bias, K, pad_type)
        ok &= bool(np.allclose(np.asarray(out), np.asarray(ref_m), atol=1e-2, rtol=1e-2))
        ok &= bool(np.allclose(np.asarray(out), np.asarray(ref_f), atol=3e-2, rtol=3e-2))

    assert ok
    print("KERNEL_OK")
</pallas_src>

<mosaic_0001>
module attributes {stable_mosaic.version = 11 : i64} {
  func.func @_conv1d_kernel(%arg0: i32, %arg1: i32, %arg2: memref<1x32x32xf32, #tpu.memory_space<vmem>>, %arg3: memref<1x8x32xf32, #tpu.memory_space<vmem>>, %arg4: memref<1x8x32xf32, #tpu.memory_space<vmem>>, %arg5: memref<384x128xbf16, #tpu.memory_space<vmem>>, %arg6: memref<1x128xf32, #tpu.memory_space<vmem>>, %arg7: memref<1x8x128xbf16, #tpu.memory_space<vmem>>) attributes {dimension_semantics = [#tpu.dimension_semantics<parallel>, #tpu.dimension_semantics<parallel>], iteration_bounds = array<i64: 2, 1>, scalar_prefetch = 0 : i64, scratch_operands = 0 : i64, tpu.core_type = #tpu.core_type<tc>, window_params = [{transform_indices = @transform_0, window_bounds = array<i64: 1, 32, 32>}, {transform_indices = @transform_1, window_bounds = array<i64: 1, 8, 32>}, {transform_indices = @transform_2, window_bounds = array<i64: 1, 8, 32>}, {pipeline_mode = #tpu.pipeline_mode<synchronous>, transform_indices = @transform_3, window_bounds = array<i64: 384, 128>}, {pipeline_mode = #tpu.pipeline_mode<synchronous>, transform_indices = @transform_4, window_bounds = array<i64: 1, 128>}, {transform_indices = @transform_5, window_bounds = array<i64: 1, 8, 128>}]} {
    %c0 = arith.constant 0 : index
    %c0_0 = arith.constant 0 : index
    %c0_1 = arith.constant 0 : index
    %0 = vector.load %arg2[%c0, %c0_0, %c0_1] : memref<1x32x32xf32, #tpu.memory_space<vmem>>, vector<1x32x32xf32>
    %1 = vector.shape_cast %0 : vector<1x32x32xf32> to vector<32x32xf32>
    %2 = tpu.iota {dimensions = array<i32: 0>} : vector<32x1xi32>
    %c32_i32 = arith.constant 32 : i32
    %3 = arith.muli %arg1, %c32_i32 : i32
    %4 = vector.broadcast %3 : i32 to vector<32x1xi32>
    %5 = arith.addi %2, %4 : vector<32x1xi32>
    %c16_i32 = arith.constant 16 : i32
    %6 = vector.broadcast %c16_i32 : i32 to vector<32x1xi32>
    %7 = arith.cmpi slt, %5, %6 : vector<32x1xi32>
    %cst = arith.constant 0.000000e+00 : f32
    %8 = vector.shape_cast %7 : vector<32x1xi1> to vector<32x1xi1>
    %9 = vector.broadcast %8 : vector<32x1xi1> to vector<32x32xi1>
    %10 = vector.broadcast %cst : f32 to vector<32x32xf32>
    %11 = arith.select %9, %1, %10 : vector<32x32xi1>, vector<32x32xf32>
    %c0_2 = arith.constant 0 : index
    %c0_3 = arith.constant 0 : index
    %c0_4 = arith.constant 0 : index
    %12 = vector.load %arg3[%c0_2, %c0_3, %c0_4] : memref<1x8x32xf32, #tpu.memory_space<vmem>>, vector<1x8x32xf32>
    %13 = vector.shape_cast %12 : vector<1x8x32xf32> to vector<8x32xf32>
    %14 = vector.extract_strided_slice %13 {offsets = [6, 0], sizes = [2, 32], strides = [1, 1]} : vector<8x32xf32> to vector<2x32xf32>
    %c0_i32 = arith.constant 0 : i32
    %15 = arith.cmpi sgt, %arg1, %c0_i32 : i32
    %16 = arith.extui %15 : i1 to i32
    %17 = arith.sitofp %16 : i32 to f32
    %18 = vector.broadcast %17 : f32 to vector<2x32xf32>
    %19 = arith.mulf %14, %18 : vector<2x32xf32>
    %20 = tpu.concatenate %19, %11 in 0 : vector<2x32xf32>, vector<32x32xf32> -> vector<34x32xf32>
    %21 = vector.extract_strided_slice %20 {offsets = [0, 0], sizes = [8, 32], strides = [1, 1]} : vector<34x32xf32> to vector<8x32xf32>
    %22 = arith.truncf %21 : vector<8x32xf32> to vector<8x32xbf16>
    %23 = vector.extract_strided_slice %20 {offsets = [1, 0], sizes = [8, 32], strides = [1, 1]} : vector<34x32xf32> to vector<8x32xf32>
    %24 = arith.truncf %23 : vector<8x32xf32> to vector<8x32xbf16>
    %25 = vector.extract_strided_slice %20 {offsets = [2, 0], sizes = [8, 32], strides = [1, 1]} : vector<34x32xf32> to vector<8x32xf32>
    %26 = arith.truncf %25 : vector<8x32xf32> to vector<8x32xbf16>
    %27 = vector.extract_strided_slice %20 {offsets = [8, 0], sizes = [8, 32], strides = [1, 1]} : vector<34x32xf32> to vector<8x32xf32>
    %28 = arith.truncf %27 : vector<8x32xf32> to vector<8x32xbf16>
    %29 = vector.extract_strided_slice %20 {offsets = [9, 0], sizes = [8, 32], strides = [1, 1]} : vector<34x32xf32> to vector<8x32xf32>
    %30 = arith.truncf %29 : vector<8x32xf32> to vector<8x32xbf16>
    %31 = vector.extract_strided_slice %20 {offsets = [10, 0], sizes = [8, 32], strides = [1, 1]} : vector<34x32xf32> to vector<8x32xf32>
    %32 = arith.truncf %31 : vector<8x32xf32> to vector<8x32xbf16>
    %33 = vector.extract_strided_slice %20 {offsets = [16, 0], sizes = [8, 32], strides = [1, 1]} : vector<34x32xf32> to vector<8x32xf32>
    %34 = arith.truncf %33 : vector<8x32xf32> to vector<8x32xbf16>
    %35 = vector.extract_strided_slice %20 {offsets = [17, 0], sizes = [8, 32], strides = [1, 1]} : vector<34x32xf32> to vector<8x32xf32>
    %36 = arith.truncf %35 : vector<8x32xf32> to vector<8x32xbf16>
    %37 = vector.extract_strided_slice %20 {offsets = [18, 0], sizes = [8, 32], strides = [1, 1]} : vector<34x32xf32> to vector<8x32xf32>
    %38 = arith.truncf %37 : vector<8x32xf32> to vector<8x32xbf16>
    %39 = vector.extract_strided_slice %20 {offsets = [24, 0], sizes = [8, 32], strides = [1, 1]} : vector<34x32xf32> to vector<8x32xf32>
    %40 = arith.truncf %39 : vector<8x32xf32> to vector<8x32xbf16>
    %41 = vector.extract_strided_slice %20 {offsets = [25, 0], sizes = [8, 32], strides = [1, 1]} : vector<34x32xf32> to vector<8x32xf32>
    %42 = arith.truncf %41 : vector<8x32xf32> to vector<8x32xbf16>
    %43 = vector.extract_strided_slice %20 {offsets = [26, 0], sizes = [8, 32], strides = [1, 1]} : vector<34x32xf32> to vector<8x32xf32>
    %44 = arith.truncf %43 : vector<8x32xf32> to vector<8x32xbf16>
    %45 = tpu.concatenate %22, %24, %26, %28, %30, %32, %34, %36, %38, %40, %42, %44 in 1 : vector<8x32xbf16>, vector<8x32xbf16>, vector<8x32xbf16>, vector<8x32xbf16>, vector<8x32xbf16>, vector<8x32xbf16>, vector<8x32xbf16>, vector<8x32xbf16>, vector<8x32xbf16>, vector<8x32xbf16>, vector<8x32xbf16>, vector<8x32xbf16> -> vector<8x384xbf16>
    %c0_5 = arith.constant 0 : index
    %c0_6 = arith.constant 0 : index
    %46 = vector.load %arg5[%c0_5, %c0_6] : memref<384x128xbf16, #tpu.memory_space<vmem>>, vector<384x128xbf16>
    %cst_7 = arith.constant dense<0.000000e+00> : vector<8x128xf32>
    %47 = tpu.matmul %45, %46, %cst_7 {dimension_numbers = #tpu.dot_dimension_numbers<[1], [0], [0], [1], [0, 0, 1, 1], [], []>} : vector<8x384xbf16>, vector<384x128xbf16>, vector<8x128xf32> -> vector<8x128xf32>
    %c0_8 = arith.constant 0 : index
    %c0_9 = arith.constant 0 : index
    %48 = vector.load %arg6[%c0_8, %c0_9] : memref<1x128xf32, #tpu.memory_space<vmem>>, vector<1x128xf32>
    %49 = vector.broadcast %48 : vector<1x128xf32> to vector<8x128xf32>
    %50 = arith.addf %47, %49 : vector<8x128xf32>
    %51 = arith.truncf %50 : vector<8x128xf32> to vector<8x128xbf16>
    %c0_10 = arith.constant 0 : index
    %c0_11 = arith.constant 0 : index
    %c0_12 = arith.constant 0 : index
    %52 = vector.load %arg7[%c0_10, %c0_11, %c0_12] : memref<1x8x128xbf16, #tpu.memory_space<vmem>>, vector<1x8x128xbf16>
    %53 = vector.shape_cast %52 : vector<1x8x128xbf16> to vector<8x128xbf16>
    %54 = vector.shape_cast %51 : vector<8x128xbf16> to vector<1x8x128xbf16>
    tpu.vector_store %arg7[%c0_10, %c0_11, %c0_12], %54 {strides = array<i32>} : memref<1x8x128xbf16, #tpu.memory_space<vmem>>, vector<1x8x128xbf16>,
    return
  }
  func.func @transform_0(%arg0: i32, %arg1: i32) -> (i32, i32, i32) {
    %c0_i32 = arith.constant 0 : i32
    %c0_i32_0 = arith.constant 0 : i32
    return %arg0, %arg1, %c0_i32 : i32, i32, i32
  }
  func.func @transform_1(%arg0: i32, %arg1: i32) -> (i32, i32, i32) {
    %c4_i32 = arith.constant 4 : i32
    %0 = arith.muli %arg1, %c4_i32 : i32
    %c1_i32 = arith.constant 1 : i32
    %1 = arith.subi %0, %c1_i32 : i32
    %c0_i32 = arith.constant 0 : i32
    %2 = arith.maxsi %1, %c0_i32 : i32
    %c0_i32_0 = arith.constant 0 : i32
    %c0_i32_1 = arith.constant 0 : i32
    return %arg0, %2, %c0_i32_0 : i32, i32, i32
  }
  func.func @transform_2(%arg0: i32, %arg1: i32) -> (i32, i32, i32) {
    %c1_i32 = arith.constant 1 : i32
    %0 = arith.addi %arg1, %c1_i32 : i32
    %c4_i32 = arith.constant 4 : i32
    %1 = arith.muli %0, %c4_i32 : i32
    %c3_i32 = arith.constant 3 : i32
    %2 = arith.minsi %1, %c3_i32 : i32
    %c0_i32 = arith.constant 0 : i32
    %c0_i32_0 = arith.constant 0 : i32
    return %arg0, %2, %c0_i32 : i32, i32, i32
  }
  func.func @transform_3(%arg0: i32, %arg1: i32) -> (i32, i32) {
    %c0_i32 = arith.constant 0 : i32
    %c0_i32_0 = arith.constant 0 : i32
    %c0_i32_1 = arith.constant 0 : i32
    return %c0_i32, %c0_i32_0 : i32, i32
  }
  func.func @transform_4(%arg0: i32, %arg1: i32) -> (i32, i32) {
    %c0_i32 = arith.constant 0 : i32
    %c0_i32_0 = arith.constant 0 : i32
    %c0_i32_1 = arith.constant 0 : i32
    return %c0_i32, %c0_i32_0 : i32, i32
  }
  func.func @transform_5(%arg0: i32, %arg1: i32) -> (i32, i32, i32) {
    %c0_i32 = arith.constant 0 : i32
    %c0_i32_0 = arith.constant 0 : i32
    return %arg0, %arg1, %c0_i32 : i32, i32, i32
  }
}

</mosaic_0001>

<bundles_post_ra>
// kernel: tpu_custom_call.1
= control target key start
LH: loop header
LB: loop body
LE: loop exit
PB: predicated region body
PF: predicated region fallthrough
CT: control target
= control target key end

     0   :  { %s1800_s0 = inlined_call_operand.hbm [shape: f32[2,32,32], index: 0, kind: input, shape index: {}]   ;;  %s1801_s1 = inlined_call_operand.hbm [shape: f32[2,32,32], index: 1, kind: input, shape index: {}]   ;;  %s1802_s2 = inlined_call_operand.hbm [shape: f32[2,32,32], index: 2, kind: input, shape index: {}]   ;;  %s1803_s3 = inlined_call_operand.hbm [shape: bf16[384,128], index: 3, kind: input, shape index: {}]   ;;  %s1804_s4 = inlined_call_operand.vmem [shape: f32[1,128], index: 4, kind: input, shape index: {}]   ;;  %s1805_s5 = inlined_call_operand.hbm [shape: bf16[2,8,128], index: 5, kind: output, shape index: {}]  }
   0x1   :  { %1824 = sst [smem:[#allocation22_spill]] %s1801_s1 }
   0x2   :  { %1825 = sst [smem:[#allocation23_spill]] %s1805_s5 }
   0x3   :  { %10 = vsyncpa [#allocation3], 0 }
   0x4   :  { %12 = vsyncpa [#allocation3 + $0x1], 0 }
   0x5   :  { %13 = vsyncpa [#allocation6], 0 }
   0x6   :  { %15 = vsyncpa [#allocation6 + $0x1], 0 }
   0x7   :  { %16 = vsyncpa [#allocation9], 0 }
   0x8   :  { %17 = vsyncpa [#allocation4], 0 }
   0x9   :  { %19 = vsyncpa [#allocation4 + $0x1], 0  ;;  %s1448_s18 = smov 0   ;;  %s1450_s19 = smov 0  }
   0xa   :  { %s1452_s20 = smov 0   ;;  %s1454_s21 = smov 0  }
   0xb   :  { %s1456_s22 = smov 0   ;;  %s1458_s23 = smov 0  }
   0xc LB: > { %1826 = sst [smem:[#allocation15_spill]] %s1382_s18  ;;  %s37_s24 = sadd.s32 1, %s1398_s22  ;;  %s1402_s23 = sphi %s1458_s23, %s25_s23   ;;  %s1398_s22 = sphi %s1456_s22, %s1860_s22   ;;  %s1394_s21 = sphi %s1454_s21, %s1859_s21   ;;  %s1390_s20 = sphi %s1452_s20, %s1858_s20   ;;  %s1386_s19 = sphi %s1450_s19, %s1862_s19   ;;  %s1382_s18 = sphi %s1448_s18, %s1861_s18  }
   0xd   : > { %1827 = sst [smem:[#allocation16_spill]] %s1390_s20  ;;  %s46_s25 = sadd.s32 1, %s1390_s20 }
   0xe   : > { %1828 = sst [smem:[#allocation17_spill]] %s1398_s22  ;;  %p39_p0 = scmp.ge.s32.totalorder %s37_s24, 2 }
   0xf   : > { %1829 = sst [smem:[#allocation18_spill]] %s1402_s23  ;;  %p1806_p1 = scmp.ne.s32.totalorder %s1390_s20, %s1386_s19 }
  0x10   : > { %p54_p2 = scmp.eq.s32.totalorder %s1402_s23, 0  ;;  %s1864_s24 = smov (%p39_p0, %s37_s24), 0 }
  0x11   : > { %1830 = sst [smem:[#allocation19_spill]] %s1864_s24  ;;  %p1109_p5 = scmp.lt.s32.totalorder %s1402_s23, 2 }
  0x12   : > { %p55_p4 = por %p54_p2, %p1806_p1  ;;  %s41_s26 = ssub.s32 %s1398_s22, %s1864_s24 }
  0x13   : > { %s1493_s27 = sand.u32 1, %s1390_s20   ;;  %p44_p6 = scmp.eq.s32.totalorder %s41_s26, 0 }
  0x14   : > { %s1496_s28 = sshll.u32 %s1398_s22, 9  ;;  %p1504_p7 = pnand %p1109_p5, %p55_p4 }
  0x15   : > { %s1502_s6 = scalar_lea.hbm %s1800_s0, %s1496_s28  ;;  %s264_s9 = sand.u32 1, %s1402_s23  }
  0x16   : > { %s1831_s7 = scalar_select %p1504_p7, 1, 0 }
  0x17   : > { %s1509_s8 = scalar_select %p44_p6, %s1390_s20, %s46_s25  }
  0x18   : > { %s1807_s10 = sshll.u32 %s1493_s27, 3  ;;  %s1833_s1 = sld [smem:[#allocation22_spill]] }
  0x19   : > { %1832 = sst [smem:[#allocation20_spill]] %s1509_s8  ;;  %s268_s14 = scalar_lea.vmem [#allocation5], %s1807_s10 }
  0x1a   : > { %s281_s15 = sshll.u32 %s268_s14, 4  ;;  %s1523_s16 = scalar_lea.sflag [#allocation6], %s264_s9  ;;  %s1521_s15 = int_to_ptr.vmem [resolvable:$true] %s281_s15 }
  0x1b   : > { %p1529_p9 = pneg %p1504_p7 }
  0x1d   : > { %s1834_s25 = scalar_select %p1529_p9, 1, 0 }
  0x1e   : > { %s1517_s13 = scalar_lea.hbm %s1833_s1, %s1496_s28  ;;  %s1199_s30 = scalar_lea.hbm %s1833_s1, 1024 }
  0x1f   : > { %s1194_s17 = scalar_lea.hbm %s1517_s13, 128  ;;  %p1200_p12 = scmp.lt.u32.totalorder %s1517_s13, %s1833_s1 }
  0x20   : > { %p1195_p8 = scmp.ne.s32.totalorder %s1517_s13, %s1194_s17  ;;  %p1201_p13 = scmp.lt.u32.totalorder %s1199_s30, %s1194_s17 }
  0x21   : > { %p1203_p2 = scmp.lt.u32.totalorder %s1194_s17, %s1517_s13 }
  0x22   : > { %p1197_p10 = pnand %p1529_p9, %p1195_p8  ;;  %p1202_p0 = por %p1201_p13, %p1200_p12 }
  0x24   : > { %p1198_p11 = pneg %p1197_p10  ;;  %p1204_p4 = por %p1203_p2, %p1202_p0 }
  0x26   : > { %p1205_p5 = pnand %p1204_p4, %p1198_p11 }
  0x28   : > { %1208 = shalt.err (!%p1205_p5)
}
  0x29   : > { %s1209_s9 = scalar_lea.vmem %s1521_s15, 128  ;;  %s1404_s14 = smov [#allocation5]  }
  0x2a   : > { %p1210_p6 = scmp.ne.s32.totalorder %s1521_s15, %s1209_s9  ;;  %s1214_s26 = sshll.u32 %s1404_s14, 4  ;;  %s1215_s26 = int_to_ptr.vmem [resolvable:$false] %s1214_s26 }
  0x2b   : > { %s1216_s29 = scalar_lea.vmem %s1215_s26, 256  ;;  %p1217_p3 = scmp.lt.s32.totalorder %s1521_s15, %s1215_s26 }
  0x2c   : > { %p1212_p8 = pnand %p1210_p6, %p1529_p9  ;;  %p1218_p1 = scmp.lt.s32.totalorder %s1216_s29, %s1209_s9 }
  0x2e   : > { %p1213_p10 = pneg %p1212_p8  ;;  %p1219_p12 = por %p1218_p1, %p1217_p3 }
  0x30   : > { %p1220_p13 = pnand %p1219_p12, %p1213_p10 }
  0x32   : > { %1223 = shalt.err (!%p1220_p13)
}
  0x33   : > { %1100 = dma.hbm_to_vmem [thread:$0]  (!%p1504_p7), %s1517_s13, 128, %s1521_s15, %s1523_s16  }
  0x34   : > { %s1554_s17 = sadd.s32 4294967295, %s1402_s23   ;;  %s975_s30 = sadd.s32 4294967294, %s1402_s23  }
  0x35   : > { %p59_p1 = scmp.ne.s32.totalorder %s1386_s19, %s1382_s18  ;;  %p1813_p3 = scmp.eq.s32.totalorder %s1554_s17, 0 }
  0x36   : > { %p199_p11 = scmp.eq.s32.totalorder %s1554_s17, 1  ;;  %p205_p0 = scmp.eq.s32.totalorder %s975_s30, 1 }
  0x37   : > { %p976_p2 = scmp.ge.s32.totalorder %s1402_s23, 1  ;;  %p1564_p4 = por %p1813_p3, %p59_p1 }
  0x38   : > { %p1836_p5 = scmp.ne.s32.totalorder %s1390_s20, %s1386_s19  ;;  %p1575_p8 = por %p205_p0, %p59_p1 }
  0x39   : > { %s1835_s11 = scalar_select %p1564_p4, 1, 0 }
  0x3a   : > { %p1571_p6 = por %p199_p11, %p1836_p5  ;;  %p212_p10 = scmp.lt.s32.totalorder %s1402_s23, 3 }
  0x3b   : > { %s1838_s15 = scalar_select %p1575_p8, 1, 0 }
  0x3c   : > { %s1837_s13 = scalar_select %p1571_p6, 1, 0 }
  0x3d   : > { %1839 = sst [smem:[#allocation21_spill]] %s1838_s15  ;;  %p1580_p12 = pnand %p976_p2, %p212_p10 }
  0x3e   : > { %s1405_s9 = smov [#allocation8]   ;;  %s979_s26 = sshll.u32 %s1493_s27, 5 }
  0x3f   : > { %s1840_s12 = scalar_select %p1580_p12, 1, 0 }
  0x40   : > { %s224_s14 = sshll.u32 %s1405_s9, 4  ;;  %p1090_p13 = pneg %p1580_p12  ;;  %s1584_s14 = int_to_ptr.vmem [resolvable:$true] %s224_s14 }
  0x41   : > { %s245_s30 = scalar_lea.vmem [#allocation2], %s979_s26  ;;  %s1224_s22 = scalar_lea.hbm %s1803_s3, 3072 }
  0x42   : > { %p1591_p11 = pnand %p1090_p13, %p1813_p3  ;;  %s254_s10 = sshll.u32 %s245_s30, 4  ;;  %s1595_s10 = int_to_ptr.vmem [resolvable:$true] %s254_s10 }
  0x43   : > { %p1225_p1 = scmp.ne.s32.totalorder %s1803_s3, %s1224_s22  ;;  %p1231_p10 = scmp.lt.u32.totalorder %s1224_s22, %s1803_s3 }
  0x44   : > { %p1226_p0 = pneg %p1591_p11 }
  0x46   : > { %p1227_p2 = pnand %p1226_p0, %p1225_p1 }
  0x48   : > { %p1228_p5 = pneg %p1227_p2 }
  0x4a   : > { %p1233_p13 = pnand %p1231_p10, %p1228_p5 }
  0x4c   : > { %1236 = shalt.err (!%p1233_p13)
}
  0x4d   : > { %s1237_s26 = scalar_lea.vmem %s1584_s14, 3072  ;;  %p1245_p4 = scmp.lt.s32.totalorder %s1584_s14, %s1584_s14 }
  0x4e   : > { %p1238_p3 = scmp.ne.s32.totalorder %s1584_s14, %s1237_s26  ;;  %p1246_p12 = scmp.lt.s32.totalorder %s1237_s26, %s1237_s26 }
  0x50   : > { %p1240_p8 = pnand %p1238_p3, %p1226_p0  ;;  %p1247_p7 = por %p1246_p12, %p1245_p4 }
  0x52   : > { %p1241_p6 = pneg %p1240_p8 }
  0x54   : > { %p1248_p9 = pnand %p1247_p7, %p1241_p6 }
  0x56   : > { %1251 = shalt.err (!%p1248_p9)
}
  0x57   : > { %s1406_s1 = smov 64   ;;  %s1407_s20 = smov 4  }
  0x58   : > { %1093 = dma.hbm_to_vmem [thread:$0]  (!%p1591_p11), %s1803_s3, 3072, %s1584_s14, [#allocation9], %s1406_s1, %s1406_s1, %s1407_s20  }
  0x59   : > { %s1025_s24 = sadd.s32 384, %s1496_s28  ;;  %s242_s8 = scalar_lea.sflag [#allocation3], %s1493_s27 }
  0x5a   : > { %s1252_s30 = scalar_lea.hbm %s1502_s6, 512  ;;  %p1842_p9 = scmp.ne.s32.totalorder %s1834_s25, 0 }
  0x5b   : > { %p1253_p7 = scmp.ne.s32.totalorder %s1502_s6, %s1252_s30  ;;  %s1257_s15 = scalar_lea.hbm %s1800_s0, 1024 }
  0x5c   : > { %p1258_p6 = scmp.lt.u32.totalorder %s1502_s6, %s1800_s0  ;;  %p1259_p8 = scmp.lt.u32.totalorder %s1257_s15, %s1252_s30 }
  0x5d   : > { %p1255_p3 = pnand %p1253_p7, %p1842_p9  ;;  %p1261_p1 = scmp.lt.u32.totalorder %s1252_s30, %s1502_s6 }
  0x5e   : > { %p1260_p12 = por %p1259_p8, %p1258_p6 }
  0x5f   : > { %p1256_p4 = pneg %p1255_p3 }
  0x60   : > { %p1262_p0 = por %p1261_p1, %p1260_p12 }
  0x62   : > { %p1263_p11 = pnand %p1262_p0, %p1256_p4 }
  0x64   : > { %1266 = shalt.err (!%p1263_p11)
}
  0x65   : > { %s1267_s14 = scalar_lea.vmem %s1595_s10, 512  ;;  %s1408_s29 = smov [#allocation2]  }
  0x66   : > { %p1268_p2 = scmp.ne.s32.totalorder %s1595_s10, %s1267_s14  ;;  %s1272_s1 = sshll.u32 %s1408_s29, 4  ;;  %s1273_s1 = int_to_ptr.vmem [resolvable:$false] %s1272_s1 }
  0x67   : > { %s1274_s5 = scalar_lea.vmem %s1273_s1, 1024  ;;  %p1275_p13 = scmp.lt.s32.totalorder %s1595_s10, %s1273_s1 }
  0x68   : > { %p1270_p5 = pnand %p1268_p2, %p1842_p9  ;;  %p1276_p7 = scmp.lt.s32.totalorder %s1274_s5, %s1267_s14 }
  0x6a   : > { %p1271_p10 = pneg %p1270_p5  ;;  %p1277_p3 = por %p1276_p7, %p1275_p13 }
  0x6c   : > { %p1278_p6 = pnand %p1277_p3, %p1271_p10 }
  0x6e   : > { %1281 = shalt.err (!%p1278_p6)
}
  0x6f   : > { %s1409_s18 = smov 128   ;;  %s1410_s15 = smov 8  }
  0x70   : > { %p1843_p4 = scmp.ne.s32.totalorder %s1831_s7, 0  ;;  %s1648_s23 = scalar_lea.hbm %s1802_s2, %s1025_s24 }
  0x71   : > { %s1844_s30 = sshll.u32 %s1493_s27, 3  ;;  %s1282_s14 = scalar_lea.hbm %s1648_s23, 128 }
  0x72   : > { %1097 = dma.hbm_to_vmem [thread:$0]  (!%p1843_p4), %s1502_s6, 512, %s1595_s10, %s242_s8, %s1409_s18, %s1409_s18, %s1410_s15  }
  0x73   : > { %s292_s9 = scalar_lea.vmem [#allocation7], %s1844_s30  ;;  %p1283_p8 = scmp.ne.s32.totalorder %s1648_s23, %s1282_s14 }
  0x74   : > { %s305_s26 = sshll.u32 %s292_s9, 4  ;;  %s1287_s10 = scalar_lea.hbm %s1802_s2, 1024  ;;  %s306_s26 = int_to_ptr.vmem [resolvable:$true] %s305_s26 }
  0x75   : > { %p1285_p12 = pnand %p1283_p8, %p1842_p9  ;;  %p1288_p0 = scmp.lt.u32.totalorder %s1648_s23, %s1802_s2 }
  0x76   : > { %p1289_p11 = scmp.lt.u32.totalorder %s1287_s10, %s1282_s14  ;;  %p1291_p5 = scmp.lt.u32.totalorder %s1282_s14, %s1648_s23 }
  0x77   : > { %p1286_p1 = pneg %p1285_p12 }
  0x78   : > { %p1290_p2 = por %p1289_p11, %p1288_p0 }
  0x7a   : > { %p1292_p10 = por %p1291_p5, %p1290_p2 }
  0x7c   : > { %p1293_p13 = pnand %p1292_p10, %p1286_p1 }
  0x7e   : > { %1296 = shalt.err (!%p1293_p13)
}
  0x7f   : > { %s1297_s27 = scalar_lea.vmem %s306_s26, 128  ;;  %s1411_s29 = smov [#allocation7]  }
  0x80   : > { %p1298_p7 = scmp.ne.s32.totalorder %s306_s26, %s1297_s27  ;;  %s1302_s1 = sshll.u32 %s1411_s29, 4  ;;  %s1303_s1 = int_to_ptr.vmem [resolvable:$false] %s1302_s1 }
  0x81   : > { %s1304_s5 = scalar_lea.vmem %s1303_s1, 256  ;;  %p1305_p8 = scmp.lt.s32.totalorder %s306_s26, %s1303_s1 }
  0x82   : > { %p1300_p3 = pnand %p1298_p7, %p1842_p9  ;;  %p1306_p12 = scmp.lt.s32.totalorder %s1304_s5, %s1297_s27 }
  0x84   : > { %p1301_p6 = pneg %p1300_p3  ;;  %p1307_p4 = por %p1306_p12, %p1305_p8 }
  0x86   : > { %p1308_p0 = pnand %p1307_p4, %p1301_p6 }
  0x88   : > { %1311 = shalt.err (!%p1308_p0)
}
  0x89   : > { %p1845_p11 = scmp.ne.s32.totalorder %s1831_s7, 0  ;;  %p1846_p1 = scmp.ne.s32.totalorder %s1840_s12, 0 }
  0x8a   : > { %s1673_s25 = sand.u32 (!%p1846_p1), 1, %s1386_s19   ;;  %p1847_p9 = scmp.ne.s32.totalorder (!%p1846_p1), %s1835_s11, 0 }
  0x8b   : > { %1103 = dma.hbm_to_vmem [thread:$0]  (!%p1845_p11), %s1648_s23, 128, %s306_s26, %s1523_s16  }
  0x8c   : > { %314 = sbr.rel (%p1846_p1) target bundleno = 524 (0x20c), region = 40  ;;  %s989_s18 = sshll.u32 (!%p1846_p1), %s1673_s25, 5 }
  0x8d   : > { %s317_s15 = scalar_lea.sflag (!%p1846_p1), [#allocation3], %s1673_s25  ;;  %s320_s20 = scalar_lea.vmem (!%p1846_p1), [#allocation2], %s989_s18 }
  0x93   : > { %1365 = dma.done.wait (%p1847_p9), %s317_s15, 512  }
  0x94   : > { %1367 = vsyncadd (%p1847_p9), %s317_s15, 4294966784  ;;  %s325_s7 = sand.u32 1, %s1554_s17   ;;  %s990_s16 = sshll.u32 %s1673_s25, 3 }
  0x95   : > { %s326_s12 = scalar_lea.sflag [#allocation6], %s325_s7  ;;  %s329_s22 = scalar_lea.vmem [#allocation5], %s990_s16 }
  0x96   : > { %1369 = dma.done.wait (%p1847_p9), %s326_s12, 256  }
  0x97   : > { %1371 = vsyncadd (%p1847_p9), %s326_s12, 4294967040  ;;  %p1848_p4 = scmp.eq.s32.totalorder %s1554_s17, 0 }
  0x99   : > { %1373 = dma.done.wait (%p1848_p4), [#allocation9], 3072   ;;  %p1849_p2 = pmov %p1848_p4 }
  0x9a   : > { %v1412_v0 = vmov 0.0   ;;  %v389_v2 = vld [vmem:[%s320_s20] sm:$0xff]  ;;  %v390_v3 = vld [vmem:[%s320_s20 + $0x8] sm:$0xff]  ;;  %vm433_vm0 = vcmask 1041408   ;;  %s1413_s17 = smov 64   ;;  %v1175_v27 = vld [vmem:[#allocation8 + $0x50] sm:$0xff]  }
  0x9b   : > { %1375 = vsyncadd (%p1849_p2), [#allocation9], 4294964224  ;;  %1058 = vmatprep.subr.bf16.mxu1 %v1412_v0  ;;  %v437_v1 = vrot.slane %v1412_v0, 6  ;;  %v420_v4 = vld [vmem:[%s329_s22] sm:$0xff]  ;;  %v434_v5 = vrot.slane %v389_v2, 6  ;;  %v435_v6 = vrot.slane %v390_v3, 6 }
  0x9c   : > { %v425_v7 = vmul.f32 0.0, %v420_v4  ;;  %v1170_v9 = vld [vmem:[#allocation8 + $0x40] sm:$0xff]   ;;  %v1172_v17 = vld [vmem:[#allocation8 + $0x48] sm:$0xff]   ;;  %s1414_s11 = smov 32   ;;  %v1176_v33 = vld [vmem:[#allocation8 + $0x10] sm:$0xff]   ;;  %s1415_s23 = smov 96  }
  0x9d   : > { %v1693_v8 = vpack.c.bf16 %v437_v1, %v437_v1  ;;  %v436_v10 = vsel %vm433_vm0, %v434_v5, %v435_v6  ;;  %v438_v11 = vsel %vm433_vm0, %v435_v6, %v437_v1  ;;  %1027 = vmatprep.subr.bf16.mxu0 %v1170_v9  ;;  %v1171_v13 = vld [vmem:[#allocation8] sm:$0xff]   ;;  %v1173_v20 = vld [vmem:[#allocation8 + $0x8] sm:$0xff]   ;;  %v1178_v38 = vld [vmem:[#allocation8 + $0x58] sm:$0xff]   ;;  %vm1416_vm1 = vmmov 0   ;;  %s992_s30 = sshll.u32 %s1673_s25, 2  ;;  %s1019_s14 = sshll.u32 %s1394_s21, 6 }
  0x9e   : > { %v427_v12 = vrot.slane %v425_v7, 6  ;;  %v1697_v14 = vpack.c.bf16 %v438_v11, %v436_v10  ;;  %v451_v15 = vpack.c.bf16 %v438_v11, %v438_v11  ;;  %v1699_v16 = vpack.c.bf16 %v437_v1, %v438_v11  ;;  %1028 = vmatpush3.bf16.msra.mxu0 %v1171_v13  ;;  %v1174_v25 = vld [vmem:[#allocation8 + $0x80] sm:$0xff]   ;;  %v1177_v37 = vld [vmem:[#allocation8 + $0x88] sm:$0xff]   ;;  %v1179_v40 = vld [vmem:[#allocation8 + $0x18] sm:$0xff]   ;;  %1074 = vmatprep.mubr.msk.bf16.mxu1 %vm1416_vm1, %v1412_v0  ;;  %s378_s6 = scalar_lea.vmem [#allocation10], %s992_s30  ;;  %s1850_s24 = sld [smem:[#allocation23_spill]] }
  0x9f   : > { %v502_v19 = vshll.u32 %v1693_v8, 16  ;;  %1029 = vmatprep.subr.bf16.mxu0 %v1172_v17  ;;  %v500_v26 = vshrl.u32 %v1693_v8, 16  ;;  %1059 = vmatpush3.bf16.msra.mxu1 %v1174_v25  ;;  %v449_v36 = vpack.c.bf16 %v436_v10, %v436_v10  ;;  %v1180_v41 = vld [vmem:[#allocation8 + $0x90] sm:$0xff]   ;;  %v1181_v43 = vld [vmem:[#allocation8 + $0x60] sm:$0xff]   ;;  %v1183_v44 = vld [vmem:[#allocation8 + $0x98] sm:$0xff]   ;;  %v509_v47 = vrot.slane %v1693_v8, 1 }
  0xa0   : > { %v1702_v18 = vsel %vm433_vm0, %v427_v12, %v434_v5  ;;  %v479_v21 = vrot.slane %v1697_v14, 1  ;;  %483 = vrot.lane.b32.xlu1 %v451_v15, %s1413_s17  ;;  %v486_v22 = vshrl.u32 %v1699_v16, 16  ;;  %v488_v23 = vshll.u32 %v1699_v16, 16  ;;  %1060 = vmatprep.subr.bf16.mxu1 %v1412_v0  ;;  %v1182_v45 = vld [vmem:[#allocation8 + $0x20] sm:$0xff]   ;;  %v1184_v46 = vld [vmem:[#allocation8 + $0x68] sm:$0xff]   ;;  %v1187_v50 = vld [vmem:[#allocation8 + $0x70] sm:$0xff]  }
  0xa1   : > { %v448_v24 = vpack.c.bf16 %v436_v10, %v1702_v18  ;;  %v504_v32 = vrot.slane %v502_v19, 1  ;;  %v1186_v48 = vld [vmem:[#allocation8 + $0xa0] sm:$0xff]   ;;  %v1185_v49 = vld [vmem:[#allocation8 + $0x28] sm:$0xff]   ;;  %v1188_v52 = vld [vmem:[#allocation8 + $0x30] sm:$0xff]   ;;  %v474_v57 = vshll.u32 %v1697_v14, 16  ;;  %v472_v58 = vshrl.u32 %v1697_v14, 16 }
  0xa2   : > { %480 = vrot.lane.b32.xlu0 %v479_v21, %s1414_s11  ;;  %v490_v28 = vrot.slane %v488_v23, 1  ;;  %1030 = vmatpush3.bf16.msra.mxu0 %v1173_v20  ;;  %v1189_v51 = vld [vmem:[#allocation8 + $0xa8] sm:$0xff]   ;;  %v1190_v53 = vld [vmem:[#allocation8 + $0x78] sm:$0xff]   ;;  %v1192_v54 = vld [vmem:[#allocation8 + $0xb0] sm:$0xff]   ;;  %vm512_vm2 = vcmask 261120   ;;  %vm516_vm3 = vcmask 523264   ;;  %v447_v4 = vpack.c.bf16 %v1702_v18, %v1702_v18 }
  0xa3   : > { %v465_v29 = vrot.slane %v448_v24, 1  ;;  %v456_v30 = vshrl.u32 %v448_v24, 16  ;;  %v458_v31 = vshll.u32 %v448_v24, 16  ;;  %1031 = vmatprep.subr.bf16.mxu0 %v1175_v27  ;;  %1061 = vmatpush3.bf16.msra.mxu1 %v1177_v37  ;;  %v505_v42 = vor.u32 %v504_v32, %v500_v26  ;;  %v1191_v55 = vld [vmem:[#allocation8 + $0x38] sm:$0xff]   ;;  %s835_s28 = sshll.u32 %s378_s6, 4  ;;  %s821_s29 = scalar_lea.sflag [#allocation4], %s1673_s25  ;;  %s1753_s28 = int_to_ptr.vmem [resolvable:$true] %s835_s28 }
  0xa4   : > { %v491_v34 = vor.u32 %v490_v28, %v486_v22  ;;  %1062 = vmatprep.subr.bf16.mxu1 %v1412_v0  ;;  %v1193_v56 = vld [vmem:[#allocation8 + $0xb8] sm:$0xff]   ;;  %v476_v59 = vrot.slane %v474_v57, 1  ;;  %vm519_vm4 = vcmask 785408   ;;  %s1751_s27 = scalar_lea.hbm %s1850_s24, %s1019_s14  ;;  %s1312_s21 = scalar_lea.vmem %s1753_s28, 64 }
  0xa5   : > { %466 = vrot.lane.b32.xlu1 %v465_v29, %s1413_s17  ;;  %v460_v35 = vrot.slane %v458_v31, 1  ;;  %p1313_p5 = scmp.ne.s32.totalorder %s1753_s28, %s1312_s21  ;;  %p1851_p10 = scmp.ne.s32.totalorder %s1837_s13, 0 }
  0xa6   : > { %492 = vrot.lane.b32.xlu0 %v491_v34, %s1415_s23  ;;  %1032 = vmatpush3.bf16.msra.mxu0 %v1176_v33  ;;  %v477_v60 = vor.u32 %v476_v59, %v472_v58  ;;  %s1417_s1 = smov [#allocation10]  }
  0xa7   : > { %v461_v39 = vor.u32 %v460_v35, %v456_v30  ;;  %1033 = vmatprep.subr.bf16.mxu0 %v1178_v38  ;;  %1063 = vmatpush3.bf16.msra.mxu1 %v1180_v41  ;;  %p1314_p13 = pnand %p1313_p5, %p1851_p10  ;;  %s1316_s5 = sshll.u32 %s1417_s1, 4  ;;  %s1317_s5 = int_to_ptr.vmem [resolvable:$false] %s1316_s5 }
  0xa8   : > { %1064 = vmatprep.subr.bf16.mxu1 %v1412_v0  ;;  %s1318_s18 = scalar_lea.vmem %s1317_s5, 128  ;;  %p1319_p3 = scmp.lt.s32.totalorder %s1753_s28, %s1317_s5 }
  0xa9   : > { %469 = vrot.lane.b32.xlu1 %v449_v36, %s1415_s23  ;;  %p1315_p7 = pneg %p1314_p13  ;;  %p1320_p6 = scmp.lt.s32.totalorder %s1318_s18, %s1312_s21 }
  0xaa   : > { %462 = vrot.lane.b32.xlu0 %v461_v39, %s1414_s11  ;;  %1034 = vmatpush3.bf16.msra.mxu0 %v1179_v40 }
  0xab   : > { %1035 = vmatprep.subr.bf16.mxu0 %v1181_v43  ;;  %1065 = vmatpush3.bf16.msra.mxu1 %v1183_v44  ;;  %p1321_p8 = por %p1320_p6, %p1319_p3 }
  0xac   : > { %1066 = vmatprep.subr.bf16.mxu1 %v1412_v0 }
  0xad   : > { %506 = vrot.lane.b32.xlu1 %v505_v42, %s1413_s17  ;;  %p1322_p12 = pnand %p1321_p8, %p1315_p7 }
  0xae   : > { %497 = vrot.lane.b32.xlu0 %v1693_v8, %s1414_s11  ;;  %1036 = vmatpush3.bf16.msra.mxu0 %v1182_v45  ;;  %v495_v8 = vrot.slane %v1699_v16, 1  ;;  %v993_v16 = vld [vmem:[%s1804_s4] ss:$0 sm:$0xff] }
  0xaf   : > { %1037 = vmatprep.subr.bf16.mxu0 %v1184_v46  ;;  %1067 = vmatpush3.bf16.msra.mxu1 %v1186_v48 }
  0xb0   : > { %1068 = vmatprep.subr.bf16.mxu1 %v1412_v0 }
  0xb2   : > { %510 = vrot.lane.b32.xlu0 %v509_v47, %s1415_s23  ;;  %1038 = vmatpush3.bf16.msra.mxu0 %v1185_v49 }
  0xb3   : > { %1039 = vmatprep.subr.bf16.mxu0 %v1187_v50  ;;  %1069 = vmatpush3.bf16.msra.mxu1 %v1189_v51 }
  0xb4   : > { %1070 = vmatprep.subr.bf16.mxu1 %v1412_v0 }
  0xb6   : > { %1040 = vmatpush3.bf16.msra.mxu0 %v1188_v52 }
  0xb7   : > { %1041 = vmatprep.subr.bf16.mxu0 %v1190_v53  ;;  %1071 = vmatpush3.bf16.msra.mxu1 %v1192_v54 }
  0xb8   : > { %1072 = vmatprep.subr.bf16.mxu1 %v1412_v0 }
  0xba   : > { %1042 = vmatpush3.bf16.msra.mxu0 %v1191_v55 }
  0xbb   : > { %1073 = vmatpush3.bf16.msra.mxu1 %v1193_v56 }
 0x112   : > { %v484_v61 = vpop.permute.xlu1 %483 }
 0x114   : > { %v481_v62 = vpop.permute.xlu0 %480 }
 0x115   : > { %v525_v63 = vsel %vm512_vm2, %v477_v60, %v481_v62 }
 0x116   : > { %v527_v2 = vsel %vm516_vm3, %v525_v63, %v484_v61 }
 0x117   : > { %v467_v1 = vpop.permute.xlu1 %466 }
 0x118   : > { %v493_v3 = vpop.permute.xlu0 %492 }
 0x119   : > { %v529_v0 = vsel %vm519_vm4, %v527_v2, %v493_v3 }
 0x11a   : > { %770 = vmatprep.mubr.bf16.mxu0 %v529_v0 }
 0x11b   : > { %v470_v5 = vpop.permute.xlu1 %469 }
 0x11c   : > { %v463_v6 = vpop.permute.xlu0 %462 }
 0x11d   : > { %v515_v7 = vsel %vm512_vm2, %v447_v4, %v463_v6 }
 0x11e   : > { %v518_v9 = vsel %vm516_vm3, %v515_v7, %v467_v1 }
 0x11f   : > { %v521_v10 = vsel %vm519_vm4, %v518_v9, %v470_v5  ;;  %v507_v13 = vpop.permute.xlu1 %506 }
 0x120   : > { %771 = vmatmul.mubr.bf16.vlgmr.msra.gmra.mrb[0].mxu0 %v521_v10  ;;  %v498_v11 = vpop.permute.xlu0 %497 }
 0x121   : > { %v533_v12 = vsel %vm512_vm2, %v495_v8, %v498_v11 }
 0x122   : > { %v535_v14 = vsel %vm516_vm3, %v533_v12, %v507_v13 }
 0x124   : > { %v511_v15 = vpop.permute.xlu0 %510 }
 0x125   : > { %v537_v17 = vsel %vm519_vm4, %v535_v14, %v511_v15 }
 0x126   : > { %1075 = vmatmul.mubr.bf16.vlgmr.msra.gmra.mrb[0].mxu1 %v537_v17 }
 0x1f3   : > { %v1043_v18 = vpop.f32.mrb[0].mxu0 }
 0x1f4   : > { %v1044_v19 = vpop.f32.mrb[1].mxu0 }
 0x1f5   : > { %v1045_v20 = vadd.f32 %v1044_v19, %v1043_v18  ;;  %v1046_v21 = vpop.f32.mrb[2].mxu0 }
 0x1f6   : > { %v1047_v22 = vpop.f32.mrb[3].mxu0 }
 0x1f7   : > { %v773_v23 = vadd.f32 %v1045_v20, %v993_v16 }
 0x1f9   : > { %v812_v24 = vpop.f32.mrb[0].mxu1 }
 0x1fa   : > { %v813_v25 = vadd.f32 %v812_v24, %v773_v23  ;;  %v1076_v26 = vpop.f32.mrb[1].mxu1 }
 0x1fb   : > { %v815_v27 = vpop.f32.mrb[2].mxu1 }
 0x1fc   : > { %v818_v28 = vpack.c.bf16 %v813_v25, %v813_v25  ;;  %v1077_v29 = vpop.f32.mrb[3].mxu1 }
 0x1fe   : > { %819 = vst [vmem:[%s378_s6] sm:$0xf] %v818_v28 }
 0x1ff   : > { %1325 = shalt.err (!%p1322_p12)
}
 0x200   : > { %s1326_s25 = scalar_lea.hbm %s1751_s27, 64  ;;  %s1330_s7 = scalar_lea.hbm %s1850_s24, 128 }
 0x201   : > { %p1327_p0 = scmp.ne.s32.totalorder %s1751_s27, %s1326_s25  ;;  %p1331_p9 = scmp.lt.u32.totalorder %s1751_s27, %s1850_s24 }
 0x202   : > { %p1332_p4 = scmp.lt.u32.totalorder %s1330_s7, %s1326_s25  ;;  %p1334_p5 = scmp.lt.u32.totalorder %s1326_s25, %s1751_s27 }
 0x203   : > { %p1328_p11 = pnand %p1327_p0, %p1851_p10 }
 0x204   : > { %p1333_p2 = por %p1332_p4, %p1331_p9 }
 0x205   : > { %p1329_p1 = pneg %p1328_p11 }
 0x206   : > { %p1335_p13 = por %p1334_p5, %p1333_p2 }
 0x208   : > { %p1336_p7 = pnand %p1335_p13, %p1329_p1 }
 0x20a   : > { %1339 = shalt.err (!%p1336_p7)
}
 0x20b   : > { %1088 = dma.vmem_to_hbm [thread:$0]  (%p1851_p10), %s1753_s28, 64, %s1751_s27, %s821_s29  }
 0x20c PF: > { %s1852_s22 = sld [smem:[#allocation15_spill]]  ;;  %s1853_s17 = sld [smem:[#allocation21_spill]] }
 0x20d   : > { %s1854_s11 = sld [smem:[#allocation18_spill]] }
 0x212   : > { %s847_s23 = sand.u32 1, %s1852_s22   ;;  %p1855_p3 = scmp.ne.s32.totalorder %s1853_s17, 0 }
 0x213   : > { %p1856_p6 = scmp.ge.s32.totalorder %s1854_s11, 2  ;;  %s848_s30 = scalar_lea.sflag [#allocation4], %s847_s23 }
 0x215   : > { %p1105_p8 = pnand %p1856_p6, %p1855_p3 }
 0x217   : > { %1377 = dma.done.wait (!%p1105_p8), %s848_s30, 64  }
 0x218   : > { %1379 = vsyncadd (!%p1105_p8), %s848_s30, 4294967232  ;;  %s25_s23 = sadd.s32 1, %s1854_s11   ;;  %s1857_s9 = sld [smem:[#allocation16_spill]] }
 0x219   : > { %p22_p12 = scmp.ge.s32.totalorder %s25_s23, 4   ;;  %s1858_s20 = sld [smem:[#allocation20_spill]] }
 0x21a   : > { %s1859_s21 = sld [smem:[#allocation17_spill]]  ;;  %s1860_s22 = sld [smem:[#allocation19_spill]] }
 0x21b   : > { %s1861_s18 = smov %s1386_s19  ;;  %24 = sbr.rel (!%p22_p12) target bundleno = 12 (0xc), region = 113 }
 0x21e   : > { %s1862_s19 = smov %s1857_s9 }
 0x222   :  { %853 = vsyncpa [#allocation3], 1 }
 0x223   :  { %855 = vsyncpa [#allocation3 + $0x1], 1 }
 0x224   :  { %856 = vsyncpa [#allocation6], 1 }
 0x225   :  { %858 = vsyncpa [#allocation6 + $0x1], 1 }
 0x226   :  { %859 = vsyncpa [#allocation9], 1 }
 0x227   :  { %860 = vsyncpa [#allocation4], 1 }
 0x228   :  { %862 = vsyncpa [#allocation4 + $0x1], 1 }

</bundles_post_ra>
